<compile_context>
chip_gen: v6e
topology: v6e:2x2x1
jax: 0.10.0
libtpu: 0.0.40
codegen_flags: <defaults>
</compile_context>

<pallas_src>
import functools

import jax
import jax.numpy as jnp
from jax import lax
from jax.experimental import pallas as pl
from jax.experimental.pallas import tpu as pltpu


# ------------------------- graph-static preprocessing ----------------------- #

def precompute_adjn_t(adj_hom, adj_het, dtype=jnp.float32):
    """Combined normalized+transposed+0.5-scaled adjacency (graph-static).

    adjn_t[j, i] = 0.5 * (d_hom[j]*d_hom[i]*A_hom[i,j] + d_het[j]*d_het[i]*A_het[i,j])
    with d = colsum(A)^-0.5 (inf -> 0), matching the reference normalization.
    Computed once per graph with plain XLA; NOT part of the per-forward kernel.
    """
    def norm_t(adj):
        deg = jnp.sum(adj, axis=0)                          # column-sum degrees
        d = jnp.where(deg > 0.0, lax.rsqrt(deg), 0.0)
        return (d[:, None] * d[None, :]) * adj.T            # [j, i] = d_j d_i A[i, j]

    return (0.5 * (norm_t(adj_hom) + norm_t(adj_het))).astype(dtype)


def pick_gate_dtype():
    """bf16 NxN gate path on v6e/v7x (bf16 EUP/VPU); f32 on older chips (v5e)."""
    try:
        kind = jax.devices()[0].device_kind.lower()
    except Exception:  # pragma: no cover - defensive
        kind = ""
    if any(tag in kind for tag in ("v2", "v3", "v4", "v5")):
        return jnp.float32
    return jnp.bfloat16


# ------------------------------ fused kernel ------------------------------- #

def fagcn_fused_kernel(x_ref, adjn_t_ref, t1w_ref, t1b_ref, gw_ref, gb_ref,
                       t2w_ref, t2b_ref, o_ref, *, eps, num_hidden, layer_num):
    adjn_t = adjn_t_ref[...]                                 # (N, N), gate dtype
    gate_dtype = adjn_t.dtype

    # ---- input projection: h = relu(x @ W1 + b1)  (W1 pre-transposed (F,H)) ----
    h = lax.dot_general(x_ref[...], t1w_ref[...], (((1,), (0,)), ((), ())),
                        preferred_element_type=jnp.float32)
    h = jnp.maximum(h + t1b_ref[...], 0.0)                   # (N, H) f32
    raw = h

    gw_all = gw_ref[...]                                     # (L, 2H), loaded once

    # ---- FA layers (statically unrolled; h / raw stay VMEM-resident) ----
    for l in range(layer_num):
        w1 = gw_all[l:l + 1, :num_hidden]                    # (1, H) source half
        w2 = gw_all[l:l + 1, num_hidden:]                    # (1, H) target half
        b = gb_ref[l]                                        # scalar bias (SMEM)

        # s1 along lanes (1, N): small MXU matmul contracting over features.
        s1_row = lax.dot_general(w1, h, (((1,), (1,)), ((), ())),
                                 preferred_element_type=jnp.float32)
        # s2 along sublanes (N, 1): VPU broadcast-mul + lane reduce.
        s2_col = jnp.sum(h * w2, axis=1, keepdims=True)

        # Transposed edge weights, gate fused with the (already normalized,
        # transposed, 0.5-scaled) adjacency in ONE expression so only a single
        # NxN temporary is live.  wn_t[j, i] = tanh(s1[i]+s2[j]+b) * adjn_t[j, i]
        wn_t = jnp.tanh((s1_row + b).astype(gate_dtype)
                        + s2_col.astype(gate_dtype)) * adjn_t

        # aggregation: out[j, :] = sum_i Wn[i, j] * h[i, :]  ==  wn_t @ h
        # bf16 operands / f32 accumulation -> full-rate MXU on v6e/v7x.
        agg = lax.dot_general(wn_t.astype(jnp.bfloat16), h.astype(jnp.bfloat16),
                              (((1,), (0,)), ((), ())),
                              preferred_element_type=jnp.float32)
        h = eps * raw + agg

    # ---- output projection + log_softmax  (W2 pre-transposed (H, C)) ----
    logits = lax.dot_general(h, t2w_ref[...], (((1,), (0,)), ((), ())),
                             preferred_element_type=jnp.float32) + t2b_ref[...]
    m = jnp.max(logits, axis=1, keepdims=True)
    z = logits - m
    lse = jnp.log(jnp.sum(jnp.exp(z), axis=1, keepdims=True))
    o_ref[...] = z - lse


# -------------------------------- wrapper ----------------------------------- #

def _vmem_spec():
    return pl.BlockSpec(memory_space=pltpu.MemorySpace.VMEM)


def fagcn_forward(x, adjn_t, params, *, eps, layer_num):
    n, f = x.shape
    hid = params["t1_w"].shape[1]          # t1_w pre-transposed: (F, H)
    c = params["t2_w"].shape[1]            # t2_w pre-transposed: (H, C)

    adjn_bytes = n * n * jnp.dtype(adjn_t.dtype).itemsize
    cost = pl.CostEstimate(
        flops=(2 * n * f * hid
               + layer_num * (2 * n * n * hid + 4 * n * hid + 3 * n * n)
               + 2 * n * hid * c + 3 * n * c),
        transcendentals=layer_num * n * n + n * c,
        bytes_accessed=(adjn_bytes
                        + 4 * (n * f + f * hid + hid + layer_num * 2 * hid
                               + layer_num + hid * c + c + n * c)),
    )

    kern = functools.partial(fagcn_fused_kernel, eps=eps, num_hidden=hid,
                             layer_num=layer_num)
    return pl.pallas_call(
        kern,
        out_shape=jax.ShapeDtypeStruct((n, c), jnp.float32),
        in_specs=[
            _vmem_spec(),                                       # x        (N, F)
            _vmem_spec(),                                       # adjn_t   (N, N)
            _vmem_spec(),                                       # t1_w     (F, H)
            _vmem_spec(),                                       # t1_b     (1, H)
            _vmem_spec(),                                       # gate_w   (L, 2H)
            pl.BlockSpec(memory_space=pltpu.MemorySpace.SMEM),  # gate_b   (L,)
            _vmem_spec(),                                       # t2_w     (H, C)
            _vmem_spec(),                                       # t2_b     (1, C)
        ],
        out_specs=_vmem_spec(),
        compiler_params=pltpu.CompilerParams(
            vmem_limit_bytes=32 * 1024 * 1024,   # headroom over v5e's 16 MiB default
        ),
        cost_estimate=cost,
    )(x, adjn_t,
      params["t1_w"], params["t1_b"],
      params["gate_w"], params["gate_b"],
      params["t2_w"], params["t2_b"])


# --------------------------- pure-JAX f32 reference -------------------------- #

def fagcn_reference(x, adj_hom, adj_het, params, *, eps, layer_num):
    """Eval-mode reference mirroring the PyTorch module (f32, uncollapsed)."""
    hid = params["t1_w"].shape[1]
    h = jnp.maximum(x @ params["t1_w"] + params["t1_b"], 0.0)
    raw = h

    def norm(adj):
        deg = jnp.sum(adj, axis=0)
        d = jnp.where(deg > 0.0, deg ** -0.5, 0.0)
        return d[:, None] * d[None, :] * adj

    a_hom = norm(adj_hom)
    a_het = norm(adj_het)
    for l in range(layer_num):
        w = params["gate_w"][l]
        b = params["gate_b"][l]
        s1 = h @ w[:hid]                       # source scores  (N,)
        s2 = h @ w[hid:]                       # target scores  (N,)
        g = jnp.tanh(s1[:, None] + s2[None, :] + b)   # g[i, j]
        out_hom = (g * a_hom).T @ h
        out_het = (g * a_het).T @ h
        h = eps * raw + out_hom / 2.0 + out_het / 2.0
    logits = h @ params["t2_w"] + params["t2_b"]
    m = jnp.max(logits, axis=1, keepdims=True)
    z = logits - m
    return z - jnp.log(jnp.sum(jnp.exp(z), axis=1, keepdims=True))


# ----------------------------- parameter init -------------------------------- #

def xavier_normal(key, shape, gain):
    fan_out, fan_in = shape
    std = gain * (2.0 / (fan_in + fan_out)) ** 0.5
    return (std * jax.random.normal(key, shape)).astype(jnp.float32)


def linear_bias(key, fan_in, out_features):
    bound = 1.0 / (fan_in ** 0.5)
    return jax.random.uniform(key, (1, out_features), jnp.float32, -bound, bound)


def init_params(key, num_features, num_hidden, num_classes, layer_num):
    keys = jax.random.split(key, 4 + 2 * layer_num)
    gain = 1.414
    # torch Linear weights are (out, in); pre-transpose once to (in, out).
    t1_w = xavier_normal(keys[0], (num_hidden, num_features), gain).T   # (F, H)
    t2_w = xavier_normal(keys[2], (num_classes, num_hidden), gain).T    # (H, C)
    gate_w = jnp.stack(
        [xavier_normal(keys[4 + 2 * i], (1, 2 * num_hidden), gain)[0]
         for i in range(layer_num)], axis=0)                            # (L, 2H)
    gb_bound = 1.0 / ((2 * num_hidden) ** 0.5)
    gate_b = jnp.stack(
        [jax.random.uniform(keys[5 + 2 * i], (), jnp.float32, -gb_bound, gb_bound)
         for i in range(layer_num)], axis=0)                            # (L,)
    return {
        "t1_w": t1_w,
        "t1_b": linear_bias(keys[1], num_features, num_hidden),
        "t2_w": t2_w,
        "t2_b": linear_bias(keys[3], num_hidden, num_classes),
        "gate_w": gate_w,
        "gate_b": gate_b,
    }


# ---------------------------------- main ------------------------------------- #

if __name__ == "__main__":
    N = 64            # number of graph nodes
    NUM_FEATURES = 32
    NUM_HIDDEN = 32
    NUM_CLASSES = 8
    LAYER_NUM = 2
    EPS = 0.3

    key = jax.random.PRNGKey(0)
    k_feat, k_hom, k_het, k_par = jax.random.split(key, 4)

    h = jax.random.normal(k_feat, (N, NUM_FEATURES), jnp.float32)
    adj_hom = (jax.random.uniform(k_hom, (N, N)) < 0.15).astype(jnp.float32)
    adj_het = (jax.random.uniform(k_het, (N, N)) < 0.15).astype(jnp.float32)

    params = init_params(k_par, NUM_FEATURES, NUM_HIDDEN, NUM_CLASSES, LAYER_NUM)

    # Graph-static preprocessing: once per graph, outside the per-forward kernel.
    gate_dtype = pick_gate_dtype()
    adjn_t = precompute_adjn_t(adj_hom, adj_het, dtype=gate_dtype)
    adjn_t = jax.block_until_ready(adjn_t)

    out = fagcn_forward(h, adjn_t, params, eps=EPS, layer_num=LAYER_NUM)
    out = jax.block_until_ready(out)

    assert out.shape == (N, NUM_CLASSES)
    assert bool(jnp.all(jnp.isfinite(out)))

    # Tolerance check against the fp32 reference (bf16 MXU/gate drift ~1e-2).
    ref = fagcn_reference(h, adj_hom, adj_het, params, eps=EPS, layer_num=LAYER_NUM)
    max_err = float(jnp.max(jnp.abs(out - ref)))
    assert max_err < 0.25, f"kernel vs reference max abs err {max_err}"

    print("KERNEL_OK")
</pallas_src>

<mosaic_0001>
module attributes {stable_mosaic.version = 11 : i64} {
  func.func @fagcn_fused_kernel(%arg0: memref<64x32xf32, #tpu.memory_space<vmem>>, %arg1: memref<64x64xbf16, #tpu.memory_space<vmem>>, %arg2: memref<32x32xf32, #tpu.memory_space<vmem>>, %arg3: memref<1x32xf32, #tpu.memory_space<vmem>>, %arg4: memref<2x64xf32, #tpu.memory_space<vmem>>, %arg5: memref<2xf32, #tpu.memory_space<smem>>, %arg6: memref<32x8xf32, #tpu.memory_space<vmem>>, %arg7: memref<1x8xf32, #tpu.memory_space<vmem>>, %arg8: memref<64x8xf32, #tpu.memory_space<vmem>>) attributes {dimension_semantics = [], scalar_prefetch = 0 : i64, scratch_operands = 0 : i64, tpu.core_type = #tpu.core_type<tc>} {
    %c0 = arith.constant 0 : index
    %c0_0 = arith.constant 0 : index
    %0 = vector.load %arg1[%c0, %c0_0] : memref<64x64xbf16, #tpu.memory_space<vmem>>, vector<64x64xbf16>
    %c0_1 = arith.constant 0 : index
    %c0_2 = arith.constant 0 : index
    %1 = vector.load %arg0[%c0_1, %c0_2] : memref<64x32xf32, #tpu.memory_space<vmem>>, vector<64x32xf32>
    %c0_3 = arith.constant 0 : index
    %c0_4 = arith.constant 0 : index
    %2 = vector.load %arg2[%c0_3, %c0_4] : memref<32x32xf32, #tpu.memory_space<vmem>>, vector<32x32xf32>
    %cst = arith.constant dense<0.000000e+00> : vector<64x32xf32>
    %3 = tpu.matmul %1, %2, %cst {dimension_numbers = #tpu.dot_dimension_numbers<[1], [0], [0], [1], [0, 0, 1, 1], [], []>} : vector<64x32xf32>, vector<32x32xf32>, vector<64x32xf32> -> vector<64x32xf32>
    %c0_5 = arith.constant 0 : index
    %c0_6 = arith.constant 0 : index
    %4 = vector.load %arg3[%c0_5, %c0_6] : memref<1x32xf32, #tpu.memory_space<vmem>>, vector<1x32xf32>
    %5 = vector.broadcast %4 : vector<1x32xf32> to vector<64x32xf32>
    %6 = arith.addf %3, %5 : vector<64x32xf32>
    %cst_7 = arith.constant 0.000000e+00 : f32
    %7 = vector.broadcast %cst_7 : f32 to vector<64x32xf32>
    %8 = arith.maximumf %6, %7 : vector<64x32xf32>
    %c0_8 = arith.constant 0 : index
    %c0_9 = arith.constant 0 : index
    %9 = vector.load %arg4[%c0_8, %c0_9] : memref<2x64xf32, #tpu.memory_space<vmem>>, vector<2x64xf32>
    %10 = vector.extract_strided_slice %9 {offsets = [0, 0], sizes = [1, 32], strides = [1, 1]} : vector<2x64xf32> to vector<1x32xf32>
    %11 = vector.extract_strided_slice %9 {offsets = [0, 32], sizes = [1, 32], strides = [1, 1]} : vector<2x64xf32> to vector<1x32xf32>
    %c0_10 = arith.constant 0 : index
    %12 = memref.load %arg5[%c0_10] : memref<2xf32, #tpu.memory_space<smem>>
    %cst_11 = arith.constant dense<0.000000e+00> : vector<1x64xf32>
    %13 = tpu.matmul %10, %8, %cst_11 {dimension_numbers = #tpu.dot_dimension_numbers<[1], [1], [0], [0], [0, 0, 1, 0], [], []>} : vector<1x32xf32>, vector<64x32xf32>, vector<1x64xf32> -> vector<1x64xf32>
    %14 = vector.broadcast %11 : vector<1x32xf32> to vector<64x32xf32>
    %15 = arith.mulf %8, %14 : vector<64x32xf32>
    %cst_12 = arith.constant dense<0.000000e+00> : vector<64xf32>
    %16 = vector.multi_reduction <add>, %15, %cst_12 [1] : vector<64x32xf32> to vector<64xf32>
    %17 = vector.shape_cast %16 : vector<64xf32> to vector<64x1xf32>
    %18 = vector.broadcast %12 : f32 to vector<1x64xf32>
    %19 = arith.addf %13, %18 : vector<1x64xf32>
    %20 = arith.truncf %19 : vector<1x64xf32> to vector<1x64xbf16>
    %21 = arith.truncf %17 : vector<64x1xf32> to vector<64x1xbf16>
    %22 = vector.broadcast %20 : vector<1x64xbf16> to vector<64x64xbf16>
    %23 = vector.broadcast %21 : vector<64x1xbf16> to vector<64x64xbf16>
    %24 = arith.addf %22, %23 : vector<64x64xbf16>
    %25 = math.tanh %24 : vector<64x64xbf16>
    %26 = arith.mulf %25, %0 : vector<64x64xbf16>
    %27 = arith.truncf %8 : vector<64x32xf32> to vector<64x32xbf16>
    %cst_13 = arith.constant dense<0.000000e+00> : vector<64x32xf32>
    %28 = tpu.matmul %26, %27, %cst_13 {dimension_numbers = #tpu.dot_dimension_numbers<[1], [0], [0], [1], [0, 0, 1, 1], [], []>} : vector<64x64xbf16>, vector<64x32xbf16>, vector<64x32xf32> -> vector<64x32xf32>
    %cst_14 = arith.constant 3.000000e-01 : f32
    %29 = vector.broadcast %cst_14 : f32 to vector<64x32xf32>
    %30 = arith.mulf %29, %8 : vector<64x32xf32>
    %31 = arith.addf %30, %28 : vector<64x32xf32>
    %32 = vector.extract_strided_slice %9 {offsets = [1, 0], sizes = [1, 32], strides = [1, 1]} : vector<2x64xf32> to vector<1x32xf32>
    %33 = vector.extract_strided_slice %9 {offsets = [1, 32], sizes = [1, 32], strides = [1, 1]} : vector<2x64xf32> to vector<1x32xf32>
    %c1 = arith.constant 1 : index
    %34 = memref.load %arg5[%c1] : memref<2xf32, #tpu.memory_space<smem>>
    %cst_15 = arith.constant dense<0.000000e+00> : vector<1x64xf32>
    %35 = tpu.matmul %32, %31, %cst_15 {dimension_numbers = #tpu.dot_dimension_numbers<[1], [1], [0], [0], [0, 0, 1, 0], [], []>} : vector<1x32xf32>, vector<64x32xf32>, vector<1x64xf32> -> vector<1x64xf32>
    %36 = vector.broadcast %33 : vector<1x32xf32> to vector<64x32xf32>
    %37 = arith.mulf %31, %36 : vector<64x32xf32>
    %cst_16 = arith.constant dense<0.000000e+00> : vector<64xf32>
    %38 = vector.multi_reduction <add>, %37, %cst_16 [1] : vector<64x32xf32> to vector<64xf32>
    %39 = vector.shape_cast %38 : vector<64xf32> to vector<64x1xf32>
    %40 = vector.broadcast %34 : f32 to vector<1x64xf32>
    %41 = arith.addf %35, %40 : vector<1x64xf32>
    %42 = arith.truncf %41 : vector<1x64xf32> to vector<1x64xbf16>
    %43 = arith.truncf %39 : vector<64x1xf32> to vector<64x1xbf16>
    %44 = vector.broadcast %42 : vector<1x64xbf16> to vector<64x64xbf16>
    %45 = vector.broadcast %43 : vector<64x1xbf16> to vector<64x64xbf16>
    %46 = arith.addf %44, %45 : vector<64x64xbf16>
    %47 = math.tanh %46 : vector<64x64xbf16>
    %48 = arith.mulf %47, %0 : vector<64x64xbf16>
    %49 = arith.truncf %31 : vector<64x32xf32> to vector<64x32xbf16>
    %cst_17 = arith.constant dense<0.000000e+00> : vector<64x32xf32>
    %50 = tpu.matmul %48, %49, %cst_17 {dimension_numbers = #tpu.dot_dimension_numbers<[1], [0], [0], [1], [0, 0, 1, 1], [], []>} : vector<64x64xbf16>, vector<64x32xbf16>, vector<64x32xf32> -> vector<64x32xf32>
    %cst_18 = arith.constant 3.000000e-01 : f32
    %51 = vector.broadcast %cst_18 : f32 to vector<64x32xf32>
    %52 = arith.mulf %51, %8 : vector<64x32xf32>
    %53 = arith.addf %52, %50 : vector<64x32xf32>
    %c0_19 = arith.constant 0 : index
    %c0_20 = arith.constant 0 : index
    %54 = vector.load %arg6[%c0_19, %c0_20] : memref<32x8xf32, #tpu.memory_space<vmem>>, vector<32x8xf32>
    %cst_21 = arith.constant dense<0.000000e+00> : vector<64x8xf32>
    %55 = tpu.matmul %53, %54, %cst_21 {dimension_numbers = #tpu.dot_dimension_numbers<[1], [0], [0], [1], [0, 0, 1, 1], [], []>} : vector<64x32xf32>, vector<32x8xf32>, vector<64x8xf32> -> vector<64x8xf32>
    %c0_22 = arith.constant 0 : index
    %c0_23 = arith.constant 0 : index
    %56 = vector.load %arg7[%c0_22, %c0_23] : memref<1x8xf32, #tpu.memory_space<vmem>>, vector<1x8xf32>
    %57 = vector.broadcast %56 : vector<1x8xf32> to vector<64x8xf32>
    %58 = arith.addf %55, %57 : vector<64x8xf32>
    %cst_24 = arith.constant dense<0xFF800000> : vector<64xf32>
    %59 = vector.multi_reduction <maximumf>, %58, %cst_24 [1] : vector<64x8xf32> to vector<64xf32>
    %60 = vector.shape_cast %59 : vector<64xf32> to vector<64x1xf32>
    %61 = vector.broadcast %60 : vector<64x1xf32> to vector<64x8xf32>
    %62 = arith.subf %58, %61 : vector<64x8xf32>
    %63 = math.exp %62 : vector<64x8xf32>
    %cst_25 = arith.constant dense<0.000000e+00> : vector<64xf32>
    %64 = vector.multi_reduction <add>, %63, %cst_25 [1] : vector<64x8xf32> to vector<64xf32>
    %65 = vector.shape_cast %64 : vector<64xf32> to vector<64x1xf32>
    %66 = math.log %65 : vector<64x1xf32>
    %67 = vector.broadcast %66 : vector<64x1xf32> to vector<64x8xf32>
    %68 = arith.subf %62, %67 : vector<64x8xf32>
    %c0_26 = arith.constant 0 : index
    %c0_27 = arith.constant 0 : index
    %69 = vector.load %arg8[%c0_26, %c0_27] : memref<64x8xf32, #tpu.memory_space<vmem>>, vector<64x8xf32>
    tpu.vector_store %arg8[%c0_26, %c0_27], %68 {strides = array<i32>} : memref<64x8xf32, #tpu.memory_space<vmem>>, vector<64x8xf32>,
    return
  }
}

</mosaic_0001>

<bundles_post_ra>
// kernel: tpu_custom_call.1
= control target key start
LH: loop header
LB: loop body
LE: loop exit
PB: predicated region body
PF: predicated region fallthrough
CT: control target
= control target key end

     0   :  { %13 = vsyncpa [#allocation3], 0  ;;  %s1685_s0 = inlined_call_operand.vmem [shape: f32[64,32], index: 0, kind: input, shape index: {}]   ;;  %s1686_s1 = inlined_call_operand.vmem [shape: bf16[64,64], index: 1, kind: input, shape index: {}]   ;;  %s1687_s2 = inlined_call_operand.vmem [shape: f32[32,32], index: 2, kind: input, shape index: {}]   ;;  %s1688_s3 = inlined_call_operand.vmem [shape: f32[1,32], index: 3, kind: input, shape index: {}]   ;;  %s1689_s4 = inlined_call_operand.vmem [shape: f32[2,64], index: 4, kind: input, shape index: {}]   ;;  %s1690_s5 = inlined_call_operand.vmem [shape: f32[2], index: 5, kind: input, shape index: {}]   ;;  %s1691_s6 = inlined_call_operand.vmem [shape: f32[32,8], index: 6, kind: input, shape index: {}]   ;;  %s1692_s7 = inlined_call_operand.vmem [shape: f32[1,8], index: 7, kind: input, shape index: {}]   ;;  %s1693_s8 = inlined_call_operand.vmem [shape: f32[64,8], index: 8, kind: output, shape index: {}]  }
   0x1   :  { %s30_s29 = sshll.u32 %s1690_s5, 4  ;;  %s31_s29 = int_to_ptr.vmem [resolvable:$true] %s30_s29 }
   0x2   :  { %s1269_s30 = scalar_lea.vmem %s31_s29, 16  ;;  %p1274_p1 = scmp.lt.s32.totalorder %s31_s29, %s31_s29 }
   0x3   :  { %p1270_p0 = scmp.ne.s32.totalorder %s31_s29, %s1269_s30  ;;  %p1275_p2 = scmp.lt.s32.totalorder %s1269_s30, %s1269_s30 }
   0x5   :  { %p1276_p3 = por %p1275_p2, %p1274_p1 }
   0x7   :  { %p1277_p4 = pnand %p1276_p3, %p1270_p0 }
   0x9   :  { %1280 = shalt.err (!%p1277_p4)
}
   0xa   :  { %s1283_s9 = smov [#allocation2]  }
   0xb   :  { %33 = dma.vmem_to_smem %s31_s29, 16, %s1283_s9, [#allocation3]  }
   0xc   :  { %1281 = dma.done.wait [#allocation3], 16  }
   0xd   :  { %1282 = vsyncadd [#allocation3], 4294967280 }
   0xe   :  { %41 = sfence }
   0xf   :  { %v62_v0 = vld [vmem:[%s1687_s2 + $0x18] sm:$0xff]  ;;  %v61_v1 = vld [vmem:[%s1687_s2 + $0x10] sm:$0xff]  ;;  %vm70_vm0 = vcmask 261120   ;;  %v210_v2 = vlaneseq  ;;  %v51_v3 = vld [vmem:[%s1685_s0] sm:$0xff]  ;;  %v1285_v17 = vmov 0.0   ;;  %vm1286_vm1 = vmmov 0  }
  0x10   :  { %1103 = vmatprep.subr.mxu1 %v62_v0  ;;  %v60_v4 = vld [vmem:[%s1687_s2 + $0x8] sm:$0xff]  ;;  %1111 = vmatprep.mubr.msk.f32.mxu1 %vm70_vm0, %v51_v3  ;;  %v59_v6 = vld [vmem:[%s1687_s2] sm:$0xff]  ;;  %v53_v11 = vld [vmem:[%s1685_s0 + $0x10] sm:$0xff]  ;;  %vm400_vm2 = vcmask 523264   ;;  %vm886_vm3 = vcmask 64512  }
  0x11   :  { %1104 = vmatpush3.msra.mxu1 %v62_v0  ;;  %v1348_v5 = vshrl.u32 %v210_v2, 7  ;;  %v1356_v7 = vld [vmem:[%s1689_s4] sm:$0x3]  ;;  %v52_v9 = vld [vmem:[%s1685_s0 + $0x8] sm:$0xff]  ;;  %s1284_s4 = smov 96   ;;  %v54_v12 = vld [vmem:[%s1685_s0 + $0x18] sm:$0xff] }
  0x12   :  { %1105 = vmatprep.subr.mxu1 %v61_v1  ;;  %v55_v13 = vld [vmem:[%s1685_s0 + $0x20] sm:$0xff]  ;;  %v56_v14 = vld [vmem:[%s1685_s0 + $0x28] sm:$0xff]  ;;  %v57_v15 = vld [vmem:[%s1685_s0 + $0x30] sm:$0xff] }
  0x13   :  { %1106 = vmatpush3.msra.mxu1 %v61_v1  ;;  %v1359_v8 = vsub.s32 0, %v1348_v5  ;;  %v58_v16 = vld [vmem:[%s1685_s0 + $0x38] sm:$0xff]  ;;  %v996_v18 = vld [vmem:[%s1688_s3] ss:$0 sm:$0xff]  ;;  %v497_v0 = vsub.s32 1, %v1348_v5  ;;  %s209_s0 = sld [smem:[#allocation2]] }
  0x14   :  { %1107 = vmatprep.subr.mxu1 %v60_v4 }
  0x15   :  { %1108 = vmatpush3.msra.mxu1 %v60_v4  ;;  %v213_v10 = vrot.slane %v1356_v7, %v1359_v8  ;;  %v498_v1 = vrot.slane %v1356_v7, %v497_v0 }
  0x16   :  { %1109 = vmatprep.subr.mxu1 %v59_v6 }
  0x17   :  { %1110 = vmatpush3.msra.mxu1 %v59_v6  ;;  %215 = vrot.lane.b32.xlu0 %v213_v10, %s1284_s4 }
  0x18   :  { %1112 = vmatmul.mubr.msk.f32.vlgmr.msra.gmra.mxu1 %vm70_vm0, %v52_v9  ;;  %1123 = vmatprep.subr.mxu1 %v1285_v17 }
  0x19   :  { %1114 = vmatprep.mubr.msk.f32.mxu1 %vm70_vm0, %v53_v11  ;;  %v250_v10 = vstv %s209_s0 }
  0x1c   :  { %1115 = vmatmul.mubr.msk.f32.gmra.mxu1 %vm70_vm0, %v54_v12 }
  0x1d   :  { %1117 = vmatprep.mubr.msk.f32.mxu1 %vm70_vm0, %v55_v13 }
  0x20   :  { %1118 = vmatmul.mubr.msk.f32.gmra.mxu1 %vm70_vm0, %v56_v14 }
  0x21   :  { %1120 = vmatprep.mubr.msk.f32.mxu1 %vm70_vm0, %v57_v15 }
  0x24   :  { %1121 = vmatmul.mubr.msk.f32.gmra.mxu1 %vm70_vm0, %v58_v16 }
  0x25   :  { %1139 = vmatprep.mubr.msk.f32.mxu1 %vm1286_vm1, %v1285_v17 }
  0x89   :  { %v216_v22 = vpop.permute.xlu0 %215 }
  0xd8   :  { %v1113_v19 = vpop.f32.mrf.mxu1 }
  0xd9   :  { %v167_v20 = vadd.f32 %v1113_v19, %v996_v18 }
  0xda   :  { %v161_v21 = vpop.f32.mrf.mxu1 }
  0xdb   :  { %v1398_v23 = vmax.f32 %v167_v20, 0.0  ;;  %v162_v24 = vadd.f32 %v996_v18, %v161_v21 }
  0xdc   :  { %v1116_v25 = vpop.f32.mrf.mxu1 }
  0xdd   :  { %v1400_v26 = vmax.f32 %v162_v24, 0.0  ;;  %v177_v27 = vadd.f32 %v1116_v25, %v996_v18  ;;  %v219_v28 = vmul.f32 %v216_v22, %v1398_v23 }
  0xde   :  { %v171_v29 = vpop.f32.mrf.mxu1 }
  0xdf   :  { %v1403_v30 = vmax.f32 %v177_v27, 0.0  ;;  %v172_v31 = vadd.f32 %v996_v18, %v171_v29  ;;  %v229_v32 = vsel %vm70_vm0, %v219_v28, 0.0  ;;  %v218_v33 = vmul.f32 %v216_v22, %v1400_v26 }
  0xe0   :  { %230 = vadd.xlane.f32.xlu1 %v229_v32  ;;  %v1119_v34 = vpop.f32.mrf.mxu1  ;;  %v396_v62 = vpack.c.bf16 %v1398_v23, %v1400_v26  ;;  %v1476_v32 = vld [vmem:[%s1686_s1 + $0x8] sm:$0xff]  }
  0xe1   :  { %v1407_v35 = vmax.f32 %v172_v31, 0.0  ;;  %v187_v36 = vadd.f32 %v1119_v34, %v996_v18  ;;  %v226_v37 = vsel %vm70_vm0, %v218_v33, 0.0  ;;  %v221_v38 = vmul.f32 %v216_v22, %v1403_v30  ;;  %v1471_v31 = vld [vmem:[%s1686_s1] sm:$0xff]   ;;  %v1481_v33 = vld [vmem:[%s1686_s1 + $0x10] sm:$0xff]  }
  0xe2   :  { %v181_v39 = vpop.f32.mrf.mxu1  ;;  %227 = vadd.xlane.f32.xlu0 %v226_v37 }
  0xe3   :  { %v1411_v40 = vmax.f32 %v187_v36, 0.0  ;;  %v182_v41 = vadd.f32 %v996_v18, %v181_v39  ;;  %v235_v42 = vsel %vm70_vm0, %v221_v38, 0.0  ;;  %v220_v43 = vmul.f32 %v216_v22, %v1407_v35 }
  0xe4   :  { %236 = vadd.xlane.f32.xlu1 %v235_v42  ;;  %v1122_v44 = vpop.f32.mrf.mxu1  ;;  %v397_v59 = vpack.c.bf16 %v1403_v30, %v1407_v35  ;;  %v1492_v42 = vld [vmem:[%s1686_s1 + $0x18] sm:$0xff]   ;;  %s1022_s1 = sld [smem:[#allocation2 + $0x1]] }
  0xe5   :  { %v197_v45 = vadd.f32 %v1122_v44, %v996_v18  ;;  %v1415_v46 = vmax.f32 %v182_v41, 0.0  ;;  %v232_v50 = vsel %vm70_vm0, %v220_v43, 0.0  ;;  %v223_v51 = vmul.f32 %v216_v22, %v1411_v40 }
  0xe6   :  { %v191_v47 = vpop.f32.mrf.mxu1 }
  0xe7   :  { %v1417_v48 = vmax.f32 %v197_v45, 0.0  ;;  %v192_v49 = vadd.f32 %v996_v18, %v191_v47  ;;  %v241_v53 = vsel %vm70_vm0, %v223_v51, 0.0  ;;  %v222_v55 = vmul.f32 %v216_v22, %v1415_v46 }
  0xe8   :  { %233 = vadd.xlane.f32.xlu1 %v232_v50  ;;  %v398_v56 = vpack.c.bf16 %v1411_v40, %v1415_v46  ;;  %v1499_v45 = vmul.f32 0.3, %v1407_v35  ;;  %v1505_v51 = vmul.f32 0.3, %v1400_v26 }
  0xe9   :  { %v1421_v52 = vmax.f32 %v192_v49, 0.0  ;;  %1124 = vmatpush3.xpose.msk.msra.mxu1 %vm70_vm0, %v1417_v48  ;;  %v238_v57 = vsel %vm70_vm0, %v222_v55, 0.0  ;;  %v225_v61 = vmul.f32 %v216_v22, %v1417_v48  ;;  %v1511_v55 = vmul.f32 0.3, %v1403_v30 }
  0xea   :  { %1125 = vmatprep.subr.mxu1 %v1285_v17 }
  0xeb   :  { %v399_v54 = vpack.c.bf16 %v1417_v48, %v1421_v52  ;;  %v224_v58 = vmul.f32 %v216_v22, %v1421_v52  ;;  %v247_v63 = vsel %vm70_vm0, %v225_v61, 0.0 }
  0xec   :  { %242 = vadd.xlane.f32.xlu1 %v241_v53 }
  0xed   :  { %1126 = vmatpush3.xpose.msk.msra.mxu1 %vm70_vm0, %v1421_v52  ;;  %1142 = vmatprep.subr.bf16.mxu0 %v399_v54  ;;  %v244_v60 = vsel %vm70_vm0, %v224_v58, 0.0 }
  0xee   :  { %1143 = vmatpush3.bf16.msra.mxu0 %v399_v54  ;;  %1127 = vmatprep.subr.mxu1 %v1285_v17 }
  0xef   :  { %1144 = vmatprep.subr.bf16.mxu0 %v398_v56 }
  0xf0   :  { %239 = vadd.xlane.f32.xlu1 %v238_v57 }
  0xf1   :  { %1128 = vmatpush3.xpose.msk.msra.mxu1 %vm70_vm0, %v1411_v40 }
  0xf2   :  { %1145 = vmatpush3.bf16.msra.mxu0 %v398_v56  ;;  %1129 = vmatprep.subr.mxu1 %v1285_v17 }
  0xf3   :  { %1146 = vmatprep.subr.bf16.mxu0 %v397_v59 }
  0xf4   :  { %245 = vadd.xlane.f32.xlu1 %v244_v60 }
  0xf5   :  { %1130 = vmatpush3.xpose.msk.msra.mxu1 %vm70_vm0, %v1415_v46 }
  0xf6   :  { %1147 = vmatpush3.bf16.msra.mxu0 %v397_v59  ;;  %1131 = vmatprep.subr.mxu1 %v1285_v17  ;;  %v1517_v59 = vmul.f32 0.3, %v1398_v23 }
  0xf7   :  { %1148 = vmatprep.subr.bf16.mxu0 %v396_v62 }
  0xf8   :  { %248 = vadd.xlane.f32.xlu1 %v247_v63 }
  0xf9   :  { %1132 = vmatpush3.xpose.msk.msra.mxu1 %vm70_vm0, %v1403_v30 }
  0xfa   :  { %1149 = vmatpush3.bf16.msra.mxu0 %v396_v62  ;;  %1133 = vmatprep.subr.mxu1 %v1285_v17  ;;  %v1522_v62 = vmul.f32 0.3, %v1421_v52 }
  0xfb   :  { %1158 = vmatprep.subr.mxu0 %v1285_v17 }
  0xfd   :  { %1134 = vmatpush3.xpose.msk.msra.mxu1 %vm70_vm0, %v1407_v35 }
  0xfe   :  { %1135 = vmatprep.subr.mxu1 %v1285_v17 }
 0x101   :  { %1136 = vmatpush3.xpose.msk.msra.mxu1 %vm70_vm0, %v1398_v23 }
 0x102   :  { %1137 = vmatprep.subr.mxu1 %v1285_v17 }
 0x105   :  { %1138 = vmatpush3.xpose.msk.msra.mxu1 %vm70_vm0, %v1400_v26 }
 0x108   :  { %1140 = vmatmul.mubr.msk.f32.vlgmr.msra.gmra.mxu1 %vm70_vm0, %v1356_v7 }
 0x109   :  { %500 = vrot.lane.b32.xlu1 %v498_v1, %s1284_s4 }
 0x169   :  { %v231_v2 = vpop.xlane.xlu1 %230 }
 0x16b   :  { %v228_v16 = vpop.xlane.xlu0 %227 }
 0x16c   :  { %v349_v19 = vpack.c.bf16 %v231_v2, %v228_v16 }
 0x16d   :  { %v237_v3 = vpop.xlane.xlu1 %236 }
 0x171   :  { %v234_v4 = vpop.xlane.xlu1 %233 }
 0x172   :  { %v350_v5 = vpack.c.bf16 %v237_v3, %v234_v4  ;;  %v1528_v4 = vmul.f32 0.3, %v1415_v46 }
 0x175   :  { %v243_v6 = vpop.xlane.xlu1 %242 }
 0x179   :  { %v240_v9 = vpop.xlane.xlu1 %239 }
 0x17a   :  { %v351_v20 = vpack.c.bf16 %v243_v6, %v240_v9  ;;  %v1531_v6 = vmul.f32 0.3, %v1417_v48  ;;  %v1534_v9 = vmul.f32 0.3, %v1411_v40 }
 0x17d   :  { %v246_v14 = vpop.xlane.xlu1 %245 }
 0x181   :  { %v249_v22 = vpop.xlane.xlu1 %248 }
 0x182   :  { %v352_v28 = vpack.c.bf16 %v249_v22, %v246_v14 }
 0x185   :  { %v501_v49 = vpop.permute.xlu1 %500 }
 0x1c8   :  { %v344_v11 = vpop.f32.mrf.mxu1 }
 0x1c9   :  { %v345_v12 = vadd.f32 %v344_v11, %v250_v10 }
 0x1ca   :  { %v1141_v13 = vpop.f32.mrf.mxu1 }
 0x1cb   :  { %v348_v15 = vpack.c.bf16 %v345_v12, %v345_v12 }
 0x1cd   :  { %v354_v18 = vpack.i.b16 %v348_v15, %v348_v15 }
 0x1cf   :  { %v359_v21 = vrot.slane %v354_v18, %v1359_v8 }
 0x1d1   :  { %v360_v24 = vadd.bf16 %v359_v21, %v349_v19  ;;  %v361_v25 = vadd.bf16 %v359_v21, %v350_v5  ;;  %v362_v27 = vadd.bf16 %v359_v21, %v351_v20  ;;  %v363_v29 = vadd.bf16 %v359_v21, %v352_v28 }
 0x1d3   :  { %1221 = vtanh.bf16 %v360_v24 }
 0x1d4   :  { %1223 = vtanh.bf16 %v361_v25  ;;  %v536_v25 = vrot.slane %v1356_v7, 1 }
 0x1d5   :  { %1225 = vtanh.bf16 %v362_v27 }
 0x1d6   :  { %1227 = vtanh.bf16 %v363_v29 }
 0x1e1   :  { %v1222_v34 = vpop.eup %1221 }
 0x1e2   :  { %v1224_v36 = vpop.eup %1223  ;;  %v392_v37 = vmul.bf16 %v1222_v34, %v1471_v31 }
 0x1e3   :  { %v1226_v38 = vpop.eup %1225  ;;  %v393_v39 = vmul.bf16 %v1224_v36, %v1476_v32 }
 0x1e4   :  { %1150 = vmatprep.mubr.msk.bf16.mxu0 %vm400_vm2, %v392_v37  ;;  %v394_v41 = vmul.bf16 %v1226_v38, %v1481_v33  ;;  %v1228_v43 = vpop.eup %1227  ;;  %v535_v37 = vstv %s1022_s1 }
 0x1e5   :  { %1151 = vmatmul.mubr.msk.bf16.vlgmr.msra.gmra.mxu0 %vm400_vm2, %v393_v39  ;;  %v395_v44 = vmul.bf16 %v1228_v43, %v1492_v42 }
 0x1e6   :  { %1154 = vmatprep.mubr.msk.bf16.mxu0 %vm400_vm2, %v394_v41 }
 0x1ed   :  { %1155 = vmatmul.mubr.msk.bf16.gmra.mxu0 %vm400_vm2, %v395_v44 }
 0x1ee   :  { %1174 = vmatprep.mubr.msk.f32.mxu0 %vm1286_vm1, %v1285_v17 }
 0x2a5   :  { %v1152_v47 = vpop.f32.mrf.mxu0 }
 0x2a6   :  { %v1502_v50 = vadd.f32 %v1152_v47, %v1499_v45 }
 0x2a7   :  { %v447_v53 = vpop.f32.mrf.mxu0 }
 0x2a8   :  { %v1508_v54 = vadd.f32 %v1505_v51, %v447_v53  ;;  %v505_v56 = vmul.f32 %v501_v49, %v1502_v50 }
 0x2a9   :  { %v1153_v57 = vpop.f32.mrf.mxu0 }
 0x2aa   :  { %v489_v35 = vadd.f32 %v1153_v57, %v1511_v55  ;;  %v517_v58 = vsel %vm70_vm0, %v505_v56, 0.0  ;;  %v503_v26 = vmul.f32 %v501_v49, %v1508_v54 }
 0x2ab   :  { %518 = vadd.xlane.f32.xlu0 %v517_v58  ;;  %v450_v60 = vpop.f32.mrf.mxu0 }
 0x2ac   :  { %v487_v61 = vadd.f32 %v1517_v59, %v450_v60  ;;  %v506_v30 = vmul.f32 %v501_v49, %v489_v35  ;;  %v511_v1 = vsel %vm70_vm0, %v503_v26, 0.0  ;;  %v658_v19 = vpack.c.bf16 %v489_v35, %v1502_v50 }
 0x2ad   :  { %v1156_v63 = vpop.f32.mrf.mxu0 }
 0x2ae   :  { %v492_v0 = vadd.f32 %v1156_v63, %v1522_v62  ;;  %v520_v2 = vsel %vm70_vm0, %v506_v30, 0.0  ;;  %v504_v3 = vmul.f32 %v501_v49, %v487_v61  ;;  %v657_v21 = vpack.c.bf16 %v487_v61, %v1508_v54 }
 0x2af   :  { %512 = vadd.xlane.f32.xlu0 %v511_v1  ;;  %521 = vadd.xlane.f32.xlu1 %v520_v2  ;;  %v463_v23 = vpop.f32.mrf.mxu0 }
 0x2b0   :  { %v490_v10 = vadd.f32 %v1528_v4, %v463_v23  ;;  %v514_v12 = vsel %vm70_vm0, %v504_v3, 0.0  ;;  %v509_v13 = vmul.f32 %v501_v49, %v492_v0 }
 0x2b1   :  { %v1157_v52 = vpop.f32.mrf.mxu0 }
 0x2b2   :  { %v493_v11 = vadd.f32 %v1157_v52, %v1531_v6  ;;  %v529_v40 = vsel %vm70_vm0, %v509_v13, 0.0  ;;  %v507_v16 = vmul.f32 %v501_v49, %v490_v10 }
 0x2b3   :  { %515 = vadd.xlane.f32.xlu0 %v514_v12  ;;  %v466_v14 = vpop.f32.mrf.mxu0 }
 0x2b4   :  { %v491_v15 = vadd.f32 %v1534_v9, %v466_v14  ;;  %1159 = vmatpush3.xpose.msk.msra.mxu0 %vm70_vm0, %v493_v11  ;;  %v660_v46 = vpack.c.bf16 %v493_v11, %v492_v0  ;;  %v523_v18 = vsel %vm70_vm0, %v507_v16, 0.0  ;;  %v510_v22 = vmul.f32 %v501_v49, %v493_v11 }
 0x2b5   :  { %1160 = vmatprep.subr.mxu0 %v1285_v17 }
 0x2b6   :  { %1177 = vmatprep.subr.bf16.mxu1 %v660_v46  ;;  %v659_v48 = vpack.c.bf16 %v491_v15, %v490_v10  ;;  %v508_v5 = vmul.f32 %v501_v49, %v491_v15  ;;  %v532_v24 = vsel %vm70_vm0, %v510_v22, 0.0 }
 0x2b7   :  { %530 = vadd.xlane.f32.xlu0 %v529_v40  ;;  %1178 = vmatpush3.bf16.msra.mxu1 %v660_v46 }
 0x2b8   :  { %1161 = vmatpush3.xpose.msk.msra.mxu0 %vm70_vm0, %v492_v0  ;;  %1179 = vmatprep.subr.bf16.mxu1 %v659_v48  ;;  %v526_v20 = vsel %vm70_vm0, %v508_v5, 0.0 }
 0x2b9   :  { %1162 = vmatprep.subr.mxu0 %v1285_v17 }
 0x2bb   :  { %524 = vadd.xlane.f32.xlu0 %v523_v18  ;;  %1180 = vmatpush3.bf16.msra.mxu1 %v659_v48 }
 0x2bc   :  { %1163 = vmatpush3.xpose.msk.msra.mxu0 %vm70_vm0, %v491_v15  ;;  %1181 = vmatprep.subr.bf16.mxu1 %v658_v19 }
 0x2bd   :  { %1164 = vmatprep.subr.mxu0 %v1285_v17 }
 0x2bf   :  { %1182 = vmatpush3.bf16.msra.mxu1 %v658_v19  ;;  %527 = vadd.xlane.f32.xlu0 %v526_v20 }
 0x2c0   :  { %1165 = vmatpush3.xpose.msk.msra.mxu0 %vm70_vm0, %v490_v10  ;;  %1183 = vmatprep.subr.bf16.mxu1 %v657_v21 }
 0x2c1   :  { %1166 = vmatprep.subr.mxu0 %v1285_v17 }
 0x2c3   :  { %1184 = vmatpush3.bf16.msra.mxu1 %v657_v21  ;;  %533 = vadd.xlane.f32.xlu0 %v532_v24 }
 0x2c4   :  { %1167 = vmatpush3.xpose.msk.msra.mxu0 %vm70_vm0, %v489_v35 }
 0x2c5   :  { %1168 = vmatprep.subr.mxu0 %v1285_v17 }
 0x2c8   :  { %1169 = vmatpush3.xpose.msk.msra.mxu0 %vm70_vm0, %v1502_v50 }
 0x2c9   :  { %1170 = vmatprep.subr.mxu0 %v1285_v17 }
 0x2cc   :  { %1171 = vmatpush3.xpose.msk.msra.mxu0 %vm70_vm0, %v487_v61 }
 0x2cd   :  { %1172 = vmatprep.subr.mxu0 %v1285_v17 }
 0x2d0   :  { %1173 = vmatpush3.xpose.msk.msra.mxu0 %vm70_vm0, %v1508_v54 }
 0x2d3   :  { %1175 = vmatmul.mubr.msk.f32.vlgmr.msra.gmra.mxu0 %vm70_vm0, %v536_v25 }
 0x334   :  { %v519_v27 = vpop.xlane.xlu0 %518 }
 0x338   :  { %v513_v28 = vpop.xlane.xlu0 %512  ;;  %v522_v17 = vpop.xlane.xlu1 %521 }
 0x339   :  { %v635_v7 = vpack.c.bf16 %v522_v17, %v519_v27 }
 0x33c   :  { %v516_v29 = vpop.xlane.xlu0 %515 }
 0x33d   :  { %v634_v49 = vpack.c.bf16 %v516_v29, %v513_v28 }
 0x340   :  { %v531_v34 = vpop.xlane.xlu0 %530 }
 0x344   :  { %v525_v36 = vpop.xlane.xlu0 %524 }
 0x348   :  { %v528_v43 = vpop.xlane.xlu0 %527 }
 0x349   :  { %v636_v50 = vpack.c.bf16 %v528_v43, %v525_v36 }
 0x34c   :  { %v534_v54 = vpop.xlane.xlu0 %533 }
 0x34d   :  { %v637_v58 = vpack.c.bf16 %v534_v54, %v531_v34 }
 0x393   :  { %v629_v38 = vpop.f32.mrf.mxu0 }
 0x394   :  { %v630_v39 = vadd.f32 %v629_v38, %v535_v37 }
 0x395   :  { %v1176_v41 = vpop.f32.mrf.mxu0 }
 0x396   :  { %v633_v44 = vpack.c.bf16 %v630_v39, %v630_v39 }
 0x398   :  { %v639_v47 = vpack.i.b16 %v633_v44, %v633_v44 }
 0x39a   :  { %v644_v53 = vrot.slane %v639_v47, %v1359_v8 }
 0x39c   :  { %v645_v56 = vadd.bf16 %v644_v53, %v634_v49  ;;  %v646_v57 = vadd.bf16 %v644_v53, %v635_v7  ;;  %v647_v35 = vadd.bf16 %v644_v53, %v636_v50  ;;  %v648_v26 = vadd.bf16 %v644_v53, %v637_v58 }
 0x39e   :  { %1229 = vtanh.bf16 %v645_v56 }
 0x39f   :  { %1231 = vtanh.bf16 %v646_v57 }
 0x3a0   :  { %1233 = vtanh.bf16 %v647_v35 }
 0x3a1   :  { %1235 = vtanh.bf16 %v648_v26 }
 0x3ac   :  { %v1230_v60 = vpop.eup %1229 }
 0x3ad   :  { %v1232_v61 = vpop.eup %1231  ;;  %v653_v30 = vmul.bf16 %v1230_v60, %v1471_v31  ;;  %v749_v31 = vld [vmem:[%s1691_s6 + $0x18] sm:$0xff] }
 0x3ae   :  { %v1234_v63 = vpop.eup %1233  ;;  %v654_v0 = vmul.bf16 %v1232_v61, %v1476_v32  ;;  %1193 = vmatprep.subr.mxu0 %v749_v31  ;;  %v748_v32 = vld [vmem:[%s1691_s6 + $0x10] sm:$0xff] }
 0x3af   :  { %1185 = vmatprep.mubr.msk.bf16.mxu1 %vm400_vm2, %v653_v30  ;;  %v655_v8 = vmul.bf16 %v1234_v63, %v1481_v33  ;;  %v1236_v1 = vpop.eup %1235  ;;  %1194 = vmatpush3.msra.mxu0 %v749_v31  ;;  %v747_v33 = vld [vmem:[%s1691_s6 + $0x8] sm:$0xff] }
 0x3b0   :  { %1186 = vmatmul.mubr.msk.bf16.vlgmr.msra.gmra.mxu1 %vm400_vm2, %v654_v0  ;;  %v656_v2 = vmul.bf16 %v1236_v1, %v1492_v42  ;;  %1195 = vmatprep.subr.mxu0 %v748_v32  ;;  %v746_v42 = vld [vmem:[%s1691_s6] sm:$0xff] }
 0x3b1   :  { %1189 = vmatprep.mubr.msk.bf16.mxu1 %vm400_vm2, %v655_v8  ;;  %1196 = vmatpush3.msra.mxu0 %v748_v32 }
 0x3b2   :  { %1197 = vmatprep.subr.mxu0 %v747_v33 }
 0x3b3   :  { %1198 = vmatpush3.msra.mxu0 %v747_v33 }
 0x3b4   :  { %1199 = vmatprep.subr.mxu0 %v746_v42 }
 0x3b5   :  { %1200 = vmatpush3.msra.mxu0 %v746_v42 }
 0x3b8   :  { %1190 = vmatmul.mubr.msk.bf16.gmra.mxu1 %vm400_vm2, %v656_v2 }
 0x470   :  { %v1187_v3 = vpop.f32.mrf.mxu1 }
 0x471   :  { %v740_v13 = vadd.f32 %v1187_v3, %v1499_v45 }
 0x472   :  { %v707_v23 = vpop.f32.mrf.mxu1 }
 0x473   :  { %v738_v52 = vadd.f32 %v707_v23, %v1505_v51 }
 0x474   :  { %v1188_v10 = vpop.f32.mrf.mxu1 }
 0x475   :  { %1201 = vmatprep.mubr.msk.f32.mxu0 %vm70_vm0, %v738_v52  ;;  %v741_v46 = vadd.f32 %v1188_v10, %v1511_v55  ;;  %v1036_v55 = vld [vmem:[%s1692_s7] ss:$0 sm:$0xff] }
 0x476   :  { %v710_v11 = vpop.f32.mrf.mxu1 }
 0x477   :  { %v739_v12 = vadd.f32 %v710_v11, %v1517_v59 }
 0x478   :  { %v1191_v14 = vpop.f32.mrf.mxu1 }
 0x479   :  { %1202 = vmatmul.mubr.msk.f32.vlgmr.msra.gmra.mxu0 %vm70_vm0, %v739_v12  ;;  %v744_v45 = vadd.f32 %v1191_v14, %v1522_v62 }
 0x47a   :  { %v723_v15 = vpop.f32.mrf.mxu1  ;;  %1204 = vmatprep.mubr.msk.f32.mxu0 %vm70_vm0, %v740_v13 }
 0x47b   :  { %v742_v40 = vadd.f32 %v723_v15, %v1528_v4 }
 0x47c   :  { %v1192_v48 = vpop.f32.mrf.mxu1 }
 0x47d   :  { %1205 = vmatmul.mubr.msk.f32.gmra.mxu0 %vm70_vm0, %v741_v46  ;;  %v745_v16 = vadd.f32 %v1192_v48, %v1531_v6 }
 0x47e   :  { %v726_v51 = vpop.f32.mrf.mxu1  ;;  %1207 = vmatprep.mubr.msk.f32.mxu0 %vm70_vm0, %v742_v40 }
 0x47f   :  { %v743_v59 = vadd.f32 %v726_v51, %v1534_v9 }
 0x481   :  { %1208 = vmatmul.mubr.msk.f32.gmra.mxu0 %vm70_vm0, %v743_v59 }
 0x482   :  { %1210 = vmatprep.mubr.msk.f32.mxu0 %vm70_vm0, %v744_v45 }
 0x485   :  { %1211 = vmatmul.mubr.msk.f32.gmra.mxu0 %vm70_vm0, %v745_v16 }
 0x539   :  { %v1203_v4 = vpop.f32.mrf.mxu0 }
 0x53a   :  { %v853_v18 = vadd.f32 %v1203_v4, %v1036_v55 }
 0x53b   :  { %v847_v19 = vpop.f32.mrf.mxu0 }
 0x53c   :  { %v848_v5 = vadd.f32 %v1036_v55, %v847_v19  ;;  %v890_v9 = vsel %vm886_vm3, %v853_v18, -inf }
 0x53d   :  { %v1206_v62 = vpop.f32.mrf.mxu0  ;;  %891 = vmax.xlane.f32.xlu0 %v890_v9 }
 0x53e   :  { %v863_v21 = vadd.f32 %v1206_v62, %v1036_v55  ;;  %v887_v22 = vsel %vm886_vm3, %v848_v5, -inf }
 0x53f   :  { %v857_v20 = vpop.f32.mrf.mxu0 }
 0x540   :  { %v858_v27 = vadd.f32 %v1036_v55, %v857_v20  ;;  %v896_v28 = vsel %vm886_vm3, %v863_v21, -inf }
 0x541   :  { %888 = vmax.xlane.f32.xlu0 %v887_v22  ;;  %v1209_v6 = vpop.f32.mrf.mxu0 }
 0x542   :  { %v873_v24 = vadd.f32 %v1209_v6, %v1036_v55  ;;  %v893_v38 = vsel %vm886_vm3, %v858_v27, -inf }
 0x543   :  { %v867_v25 = vpop.f32.mrf.mxu0 }
 0x544   :  { %v902_v29 = vsel %vm886_vm3, %v873_v24, -inf  ;;  %v868_v37 = vadd.f32 %v1036_v55, %v867_v25 }
 0x545   :  { %897 = vmax.xlane.f32.xlu0 %v896_v28  ;;  %903 = vmax.xlane.f32.xlu1 %v902_v29  ;;  %v1212_v34 = vpop.f32.mrf.mxu0 }
 0x546   :  { %v883_v36 = vadd.f32 %v1212_v34, %v1036_v55  ;;  %v899_v44 = vsel %vm886_vm3, %v868_v37, -inf }
 0x547   :  { %v877_v41 = vpop.f32.mrf.mxu0 }
 0x548   :  { %v908_v39 = vsel %vm886_vm3, %v883_v36, -inf  ;;  %v878_v43 = vadd.f32 %v1036_v55, %v877_v41 }
 0x549   :  { %894 = vmax.xlane.f32.xlu0 %v893_v38  ;;  %909 = vmax.xlane.f32.xlu1 %v908_v39 }
 0x54a   :  { %v905_v17 = vsel %vm886_vm3, %v878_v43, -inf }
 0x54d   :  { %900 = vmax.xlane.f32.xlu0 %v899_v44 }
 0x551   :  { %906 = vmax.xlane.f32.xlu0 %v905_v17 }
 0x5c6   :  { %v892_v47 = vpop.xlane.xlu0 %891 }
 0x5c7   :  { %v1613_v7 = vsub.f32 %v853_v18, %v892_v47 }
 0x5c9   :  { %v921_v49 = vmul.f32 1.442695, %v1613_v7 }
 0x5ca   :  { %v889_v50 = vpop.xlane.xlu0 %888 }
 0x5cb   :  { %1237 = vpow2.f32 %v921_v49  ;;  %v1616_v53 = vsub.f32 %v848_v5, %v889_v50 }
 0x5cd   :  { %v919_v54 = vmul.f32 1.442695, %v1616_v53 }
 0x5ce   :  { %v904_v56 = vpop.xlane.xlu1 %903  ;;  %v898_v57 = vpop.xlane.xlu0 %897 }
 0x5cf   :  { %1239 = vpow2.f32 %v919_v54  ;;  %v1619_v35 = vsub.f32 %v873_v24, %v904_v56  ;;  %v1621_v58 = vsub.f32 %v863_v21, %v898_v57 }
 0x5d1   :  { %v925_v26 = vmul.f32 1.442695, %v1621_v58  ;;  %v929_v60 = vmul.f32 1.442695, %v1619_v35 }
 0x5d2   :  { %v910_v61 = vpop.xlane.xlu1 %909  ;;  %v895_v30 = vpop.xlane.xlu0 %894 }
 0x5d3   :  { %v1625_v63 = vsub.f32 %v883_v36, %v910_v61  ;;  %v1627_v0 = vsub.f32 %v858_v27, %v895_v30  ;;  %1241 = vpow2.f32 %v925_v26 }
 0x5d4   :  { %1243 = vpow2.f32 %v929_v60 }
 0x5d5   :  { %v923_v8 = vmul.f32 1.442695, %v1627_v0  ;;  %v933_v1 = vmul.f32 1.442695, %v1625_v63 }
 0x5d6   :  { %v901_v2 = vpop.xlane.xlu0 %900 }
 0x5d7   :  { %v1631_v31 = vsub.f32 %v868_v37, %v901_v2  ;;  %1245 = vpow2.f32 %v923_v8 }
 0x5d8   :  { %v1238_v32 = vpop.eup %1237  ;;  %1247 = vpow2.f32 %v933_v1 }
 0x5d9   :  { %v927_v33 = vmul.f32 1.442695, %v1631_v31  ;;  %v938_v42 = vsel %vm886_vm3, %v1238_v32, 0.0 }
 0x5da   :  { %939 = vadd.xlane.f32.xlu1 %v938_v42  ;;  %v907_v3 = vpop.xlane.xlu0 %906 }
 0x5db   :  { %1249 = vpow2.f32 %v927_v33  ;;  %v1635_v23 = vsub.f32 %v878_v43, %v907_v3 }
 0x5dc   :  { %v1240_v52 = vpop.eup %1239 }
 0x5dd   :  { %v931_v10 = vmul.f32 1.442695, %v1635_v23  ;;  %v935_v11 = vsel %vm886_vm3, %v1240_v52, 0.0 }
 0x5de   :  { %936 = vadd.xlane.f32.xlu0 %v935_v11 }
 0x5df   :  { %1251 = vpow2.f32 %v931_v10 }
 0x5e0   :  { %v1242_v12 = vpop.eup %1241 }
 0x5e1   :  { %v944_v13 = vsel %vm886_vm3, %v1242_v12, 0.0  ;;  %v1244_v14 = vpop.eup %1243 }
 0x5e2   :  { %945 = vadd.xlane.f32.xlu1 %v944_v13  ;;  %v950_v46 = vsel %vm886_vm3, %v1244_v14, 0.0 }
 0x5e4   :  { %v1246_v15 = vpop.eup %1245 }
 0x5e5   :  { %v941_v40 = vsel %vm886_vm3, %v1246_v15, 0.0  ;;  %v1248_v48 = vpop.eup %1247 }
 0x5e6   :  { %951 = vadd.xlane.f32.xlu1 %v950_v46  ;;  %942 = vadd.xlane.f32.xlu0 %v941_v40  ;;  %v956_v45 = vsel %vm886_vm3, %v1248_v48, 0.0 }
 0x5e8   :  { %v1250_v51 = vpop.eup %1249 }
 0x5e9   :  { %v947_v59 = vsel %vm886_vm3, %v1250_v51, 0.0 }
 0x5ea   :  { %957 = vadd.xlane.f32.xlu1 %v956_v45  ;;  %948 = vadd.xlane.f32.xlu0 %v947_v59 }
 0x5ec   :  { %v1252_v16 = vpop.eup %1251 }
 0x5ed   :  { %v953_v55 = vsel %vm886_vm3, %v1252_v16, 0.0 }
 0x5ee   :  { %954 = vadd.xlane.f32.xlu0 %v953_v55 }
 0x663   :  { %v940_v4 = vpop.xlane.xlu1 %939 }
 0x664   :  { %1253 = vlog2.f32 %v940_v4 }
 0x667   :  { %v937_v18 = vpop.xlane.xlu0 %936 }
 0x668   :  { %1255 = vlog2.f32 %v937_v18 }
 0x66b   :  { %v946_v19 = vpop.xlane.xlu1 %945 }
 0x66c   :  { %1257 = vlog2.f32 %v946_v19 }
 0x66f   :  { %v952_v5 = vpop.xlane.xlu1 %951  ;;  %v943_v9 = vpop.xlane.xlu0 %942 }
 0x670   :  { %1259 = vlog2.f32 %v952_v5 }
 0x671   :  { %v1254_v62 = vpop.eup %1253  ;;  %1261 = vlog2.f32 %v943_v9 }
 0x672   :  { %v962_v20 = vmul.f32 0.6931472, %v1254_v62 }
 0x673   :  { %v958_v22 = vpop.xlane.xlu1 %957  ;;  %v949_v6 = vpop.xlane.xlu0 %948 }
 0x674   :  { %v976_v21 = vsub.f32 %v1613_v7, %v962_v20  ;;  %1263 = vlog2.f32 %v958_v22 }
 0x675   :  { %v1256_v24 = vpop.eup %1255  ;;  %1265 = vlog2.f32 %v949_v6 }
 0x676   :  { %984 = vst.msk [vmem:[%s1693_s8 + $0x8] sm:$0xff] %vm886_vm3, %v976_v21  ;;  %v960_v25 = vmul.f32 0.6931472, %v1256_v24 }
 0x677   :  { %v955_v28 = vpop.xlane.xlu0 %954 }
 0x678   :  { %v975_v27 = vsub.f32 %v1616_v53, %v960_v25  ;;  %1267 = vlog2.f32 %v955_v28 }
 0x679   :  { %v1258_v29 = vpop.eup %1257 }
 0x67a   :  { %983 = vst.msk [vmem:[%s1693_s8] sm:$0xff] %vm886_vm3, %v975_v27  ;;  %v966_v34 = vmul.f32 0.6931472, %v1258_v29 }
 0x67c   :  { %v978_v36 = vsub.f32 %v1621_v58, %v966_v34 }
 0x67d   :  { %v1260_v37 = vpop.eup %1259 }
 0x67e   :  { %v1262_v38 = vpop.eup %1261  ;;  %986 = vst.msk [vmem:[%s1693_s8 + $0x18] sm:$0xff] %vm886_vm3, %v978_v36  ;;  %v970_v39 = vmul.f32 0.6931472, %v1260_v37 }
 0x67f   :  { %v964_v41 = vmul.f32 0.6931472, %v1262_v38 }
 0x680   :  { %v980_v43 = vsub.f32 %v1619_v35, %v970_v39 }
 0x681   :  { %v1264_v44 = vpop.eup %1263  ;;  %v977_v17 = vsub.f32 %v1627_v0, %v964_v41 }
 0x682   :  { %v1266_v47 = vpop.eup %1265  ;;  %988 = vst.msk [vmem:[%s1693_s8 + $0x28] sm:$0xff] %vm886_vm3, %v980_v43  ;;  %v974_v7 = vmul.f32 0.6931472, %v1264_v44 }
 0x683   :  { %985 = vst.msk [vmem:[%s1693_s8 + $0x10] sm:$0xff] %vm886_vm3, %v977_v17  ;;  %v968_v49 = vmul.f32 0.6931472, %v1266_v47 }
 0x684   :  { %v982_v50 = vsub.f32 %v1625_v63, %v974_v7 }
 0x685   :  { %v1268_v53 = vpop.eup %1267  ;;  %v979_v54 = vsub.f32 %v1631_v31, %v968_v49 }
 0x686   :  { %990 = vst.msk [vmem:[%s1693_s8 + $0x38] sm:$0xff] %vm886_vm3, %v982_v50  ;;  %v972_v56 = vmul.f32 0.6931472, %v1268_v53 }
 0x687   :  { %987 = vst.msk [vmem:[%s1693_s8 + $0x20] sm:$0xff] %vm886_vm3, %v979_v54 }
 0x688   :  { %v981_v57 = vsub.f32 %v1635_v23, %v972_v56 }
 0x68a   :  { %989 = vst.msk [vmem:[%s1693_s8 + $0x30] sm:$0xff] %vm886_vm3, %v981_v57 }
 0x68b   :  { %995 = vsyncpa [#allocation3], 1 }

</bundles_post_ra>
